<compile_context>
chip_gen: v7x
topology: tpu7x:2x2x1
jax: 0.10.0
libtpu: 0.0.40
codegen_flags: <defaults>
</compile_context>

<pallas_src>
import functools

import jax
import jax.numpy as jnp
from jax.experimental import pallas as pl
from jax.experimental.pallas import tpu as pltpu

_MiB = 1024 * 1024
_INV_SQRT2 = 0.7071067811865476


def _round_up(x, m):
    return (x + m - 1) // m * m


def _vmem_capacity_bytes():
    """Physical per-core VMEM; falls back to the v7x-conservative 64 MiB."""
    try:
        info = pltpu.get_tpu_info()
        cap = int(getattr(info, "vmem_capacity_bytes", 0) or 0)
        if cap > 0:
            return cap
    except Exception:
        pass
    return 64 * _MiB


def _rank_tm(M8):
    """Row-tile candidates ranked by (padding waste, >=2 row tiles, -size)."""
    cands = (1024, 768, 512, 384, 256, 128)
    if M8 <= cands[-1]:
        return [M8]                       # tiny problem: single exact tile

    def key(tm):
        mp = _round_up(M8, tm)
        return (mp - M8, 0 if mp // tm >= 2 else 1, -tm)

    return sorted(cands, key=key)


def _th_candidates(H):
    """Divisors of H (largest first); prefer 256-multiples for full MXU fill."""
    if H % 256 == 0:
        step = 256
    elif H % 128 == 0:
        step = 128
    else:
        return [H]
    return sorted((t for t in range(step, H + 1, step) if H % t == 0),
                  reverse=True)


def _resident_vmem_bytes(tm, C, H, a_bytes, w_bytes):
    return (2 * tm * C * a_bytes            # x tiles (double-buffered)
            + 2 * (C * H + H * C) * w_bytes  # both weights (2x: conservative)
            + 2 * 8 * (H + C) * w_bytes      # biases (sublane-padded)
            + 2 * tm * C * a_bytes           # out tiles
            + 2 * tm * H * 4)                # f32 hidden + GELU temporaries


def _streamed_vmem_bytes(tm, th, C, H, a_bytes, w_bytes):
    return (2 * tm * C * a_bytes             # x tiles
            + 2 * C * th * w_bytes           # W_fc column tiles
            + 2 * th * C * w_bytes           # W_proj row tiles
            + 2 * 8 * th * w_bytes           # b_fc tiles
            + 2 * 8 * C * w_bytes            # b_proj
            + 2 * tm * C * a_bytes           # out tiles
            + tm * C * 4                     # f32 accumulator scratch
            + 2 * tm * th * 4)               # f32 hidden slice + GELU temps


def _choose_config(M8, C, H, a_bytes, w_bytes, budget):
    """Returns (tm, th_or_None, resident)."""
    tm_ranked = _rank_tm(M8)

    # Weight-resident path: weights DMA'd once, no H loop / re-streaming.
    for tm in tm_ranked:
        if _resident_vmem_bytes(tm, C, H, a_bytes, w_bytes) <= budget:
            return tm, None, True

    # Streamed path: best row tile, then the largest hidden tile that fits.
    th_cands = _th_candidates(H)
    for tm in tm_ranked:
        fits = [th for th in th_cands
                if _streamed_vmem_bytes(tm, th, C, H, a_bytes, w_bytes) <= budget]
        if fits:
            return tm, fits[0], False
    return tm_ranked[-1], th_cands[-1], False   # last resort


def _gelu_exact(h):
    # Exact (erf) GELU in f32 — matches torch.nn.GELU() default.
    return 0.5 * h * (1.0 + jax.lax.erf(h * jnp.float32(_INV_SQRT2)))


def _ffn_resident_kernel(x_ref, w1_ref, b1_ref, w2_ref, b2_ref, o_ref):
    # x_ref: (tm, C)  w1_ref: (C, H)  b1_ref: (1, H)  w2_ref: (H, C)
    # b2_ref: (1, C)  o_ref: (tm, C).  Weights have constant index maps, so
    # they are fetched once and stay VMEM-resident across all row tiles.
    h = jnp.dot(x_ref[...], w1_ref[...], preferred_element_type=jnp.float32)
    h = _gelu_exact(h + b1_ref[...].astype(jnp.float32))
    y = jnp.dot(h.astype(w2_ref.dtype), w2_ref[...],
                preferred_element_type=jnp.float32)
    o_ref[...] = (y + b2_ref[...].astype(jnp.float32)).astype(o_ref.dtype)


def _ffn_streamed_kernel(x_ref, w1_ref, b1_ref, w2_ref, b2_ref, o_ref, acc_ref):
    # x_ref:  (tm, C)   w1_ref: (C, th)  b1_ref: (1, th)
    # w2_ref: (th, C)   b2_ref: (1, C)   o_ref:  (tm, C)
    # acc_ref: (tm, C) f32 scratch accumulator, resident across the H axis.
    h_idx = pl.program_id(1)

    # Fold the c_proj bias into the accumulator init.
    @pl.when(h_idx == 0)
    def _():
        acc_ref[...] = jnp.broadcast_to(
            b2_ref[...].astype(jnp.float32), acc_ref.shape)

    h = jnp.dot(x_ref[...], w1_ref[...], preferred_element_type=jnp.float32)
    h = _gelu_exact(h + b1_ref[...].astype(jnp.float32))
    # Cast GELU output back to the weight dtype so bf16 weights keep the fast
    # MXU path; accumulate in f32.
    acc_ref[...] += jnp.dot(h.astype(w2_ref.dtype), w2_ref[...],
                            preferred_element_type=jnp.float32)

    @pl.when(h_idx == pl.num_programs(1) - 1)
    def _():
        o_ref[...] = acc_ref[...].astype(o_ref.dtype)


@functools.partial(jax.jit,
                   static_argnames=("tm", "th", "prefer_bf16_weights"))
def feed_forward(x, w_fc, b_fc, w_proj, b_proj, *, tm=None, th=None,
                 prefer_bf16_weights=False):
    """x: (B, T, C). Weights stored (in, out). Returns (B, T, C)."""
    B, T, C = x.shape
    H = w_fc.shape[1]                       # 4 * n_embd
    M = B * T
    M8 = _round_up(M, 8)

    if prefer_bf16_weights and w_fc.dtype == jnp.float32:
        # Optional MXU fast path for f32 models (f32 accumulation retained);
        # perturbs numerics slightly vs. an all-f32 reference.
        w_fc = w_fc.astype(jnp.bfloat16)
        w_proj = w_proj.astype(jnp.bfloat16)

    a_bytes = x.dtype.itemsize
    w_bytes = w_fc.dtype.itemsize

    # Per-TensorCore VMEM budget with headroom for Mosaic internal scratch:
    # ~48 MiB on v7x (64 MiB physical), ~96 MiB on v5e/v6e (128 MiB physical).
    vmem_cap = _vmem_capacity_bytes()
    budget = int(vmem_cap * 0.75)

    auto_tm, auto_th, resident = _choose_config(M8, C, H, a_bytes, w_bytes,
                                                budget)
    if th is not None:                      # explicit hidden tile override
        resident = th >= H
        th = min(th, H)
    if tm is None:
        tm = auto_tm
    if resident:
        th = H
    elif th is None:
        th = auto_th if auto_th is not None else _th_candidates(H)[0]
    assert H % th == 0, "hidden tile must divide 4*n_embd"

    M_pad = _round_up(M8, tm)
    n_row_tiles = M_pad // tm

    x2d = x.reshape(M, C)
    if M_pad != M:
        x2d = jnp.pad(x2d, ((0, M_pad - M), (0, 0)))

    b_fc2 = b_fc.reshape(1, H)
    b_proj2 = b_proj.reshape(1, C)

    if resident:
        footprint = _resident_vmem_bytes(tm, C, H, a_bytes, w_bytes)
    else:
        footprint = _streamed_vmem_bytes(tm, th, C, H, a_bytes, w_bytes)
    vmem_limit = int(min(vmem_cap, max(32 * _MiB, footprint + 4 * _MiB)))

    # Weights are read once on the resident path, once per row tile otherwise.
    weight_passes = 1 if resident else n_row_tiles
    cost = pl.CostEstimate(
        flops=int(4 * M_pad * C * H),            # two matmuls, 2*M*C*H each
        transcendentals=int(M_pad * H),          # erf per hidden activation
        bytes_accessed=int(2 * M_pad * C * a_bytes
                           + weight_passes * (C * H + H * C + H + C) * w_bytes),
    )

    if resident:
        out2d = pl.pallas_call(
            _ffn_resident_kernel,
            out_shape=jax.ShapeDtypeStruct((M_pad, C), x.dtype),
            grid_spec=pltpu.PrefetchScalarGridSpec(
                num_scalar_prefetch=0,
                grid=(n_row_tiles,),
                in_specs=[
                    pl.BlockSpec((tm, C), lambda i: (i, 0)),   # x row tile
                    pl.BlockSpec((C, H), lambda i: (0, 0)),    # W_fc (resident)
                    pl.BlockSpec((1, H), lambda i: (0, 0)),    # b_fc
                    pl.BlockSpec((H, C), lambda i: (0, 0)),    # W_proj (resident)
                    pl.BlockSpec((1, C), lambda i: (0, 0)),    # b_proj
                ],
                out_specs=pl.BlockSpec((tm, C), lambda i: (i, 0)),
            ),
            compiler_params=pltpu.CompilerParams(
                dimension_semantics=("parallel",),
                vmem_limit_bytes=vmem_limit,
            ),
            cost_estimate=cost,
        )(x2d, w_fc, b_fc2, w_proj, b_proj2)
    else:
        out2d = pl.pallas_call(
            _ffn_streamed_kernel,
            out_shape=jax.ShapeDtypeStruct((M_pad, C), x.dtype),
            grid_spec=pltpu.PrefetchScalarGridSpec(
                num_scalar_prefetch=0,
                grid=(n_row_tiles, H // th),
                in_specs=[
                    pl.BlockSpec((tm, C), lambda i, h: (i, 0)),  # x rows
                    pl.BlockSpec((C, th), lambda i, h: (0, h)),  # W_fc col tile
                    pl.BlockSpec((1, th), lambda i, h: (0, h)),  # b_fc tile
                    pl.BlockSpec((th, C), lambda i, h: (h, 0)),  # W_proj row tile
                    pl.BlockSpec((1, C), lambda i, h: (0, 0)),   # b_proj
                ],
                out_specs=pl.BlockSpec((tm, C), lambda i, h: (i, 0)),
                scratch_shapes=[pltpu.VMEM((tm, C), jnp.float32)],
            ),
            compiler_params=pltpu.CompilerParams(
                dimension_semantics=("parallel", "arbitrary"),
                vmem_limit_bytes=vmem_limit,
            ),
            cost_estimate=cost,
        )(x2d, w_fc, b_fc2, w_proj, b_proj2)

    return out2d[:M].reshape(B, T, C)


def _reference(x2d, w_fc, b_fc, w_proj, b_proj):
    h = x2d.astype(jnp.float32) @ w_fc.astype(jnp.float32) + b_fc
    h = 0.5 * h * (1.0 + jax.lax.erf(h * jnp.float32(_INV_SQRT2)))
    return h @ w_proj.astype(jnp.float32) + b_proj


if __name__ == "__main__":
    key = jax.random.PRNGKey(0)

    # --- Test 1: small shapes consistent with the module (n_embd=32). -------
    # Exercises the weight-resident path with a tiny exact row tile.
    B, T, C = 2, 8, 32
    H = 4 * C
    kx, k1, k2, key = jax.random.split(key, 4)
    x = jax.random.normal(kx, (B, T, C), dtype=jnp.float32)
    w_fc = 0.02 * jax.random.normal(k1, (C, H), dtype=jnp.float32)
    b_fc = jnp.zeros((H,), dtype=jnp.float32)
    w_proj = 0.02 * jax.random.normal(k2, (H, C), dtype=jnp.float32)
    b_proj = jnp.zeros((C,), dtype=jnp.float32)

    out = jax.block_until_ready(feed_forward(x, w_fc, b_fc, w_proj, b_proj))
    ref = _reference(x.reshape(B * T, C), w_fc, b_fc,
                     w_proj, b_proj).reshape(B, T, C)
    assert out.shape == (B, T, C)
    assert jnp.allclose(out, ref, atol=1e-5, rtol=1e-5), "test-1 mismatch"

    # --- Test 2: forces the streamed (H-tiled) path + row padding. ----------
    B2, T2, C2 = 2, 96, 128          # M=192 -> padded to 256 with tm=128
    H2 = 4 * C2
    kx, k1, k2, k3, k4 = jax.random.split(key, 5)
    x2 = jax.random.normal(kx, (B2, T2, C2), dtype=jnp.float32)
    w_fc2 = 0.02 * jax.random.normal(k1, (C2, H2), dtype=jnp.float32)
    b_fc2 = 0.02 * jax.random.normal(k2, (H2,), dtype=jnp.float32)
    w_proj2 = 0.02 * jax.random.normal(k3, (H2, C2), dtype=jnp.float32)
    b_proj2 = 0.02 * jax.random.normal(k4, (C2,), dtype=jnp.float32)

    out2 = jax.block_until_ready(
        feed_forward(x2, w_fc2, b_fc2, w_proj2, b_proj2, tm=128, th=128))
    ref2 = _reference(x2.reshape(B2 * T2, C2), w_fc2, b_fc2,
                      w_proj2, b_proj2).reshape(B2, T2, C2)
    assert out2.shape == (B2, T2, C2)
    assert jnp.allclose(out2, ref2, atol=1e-4, rtol=1e-4), "test-2 mismatch"

    # --- Test 3: same shapes, auto config (weight-resident + row padding). --
    out3 = jax.block_until_ready(
        feed_forward(x2, w_fc2, b_fc2, w_proj2, b_proj2))
    assert out3.shape == (B2, T2, C2)
    assert jnp.allclose(out3, ref2, atol=1e-4, rtol=1e-4), "test-3 mismatch"

    print("KERNEL_OK")
</pallas_src>

<mosaic_0001>
module attributes {stable_mosaic.version = 11 : i64} {
  func.func @_ffn_resident_kernel(%arg0: i32, %arg1: memref<16x32xf32, #tpu.memory_space<vmem>>, %arg2: memref<32x128xf32, #tpu.memory_space<vmem>>, %arg3: memref<1x128xf32, #tpu.memory_space<vmem>>, %arg4: memref<128x32xf32, #tpu.memory_space<vmem>>, %arg5: memref<1x32xf32, #tpu.memory_space<vmem>>, %arg6: memref<16x32xf32, #tpu.memory_space<vmem>>) attributes {dimension_semantics = [#tpu.dimension_semantics<parallel>], iteration_bounds = array<i64: 1>, scalar_prefetch = 0 : i64, scratch_operands = 0 : i64, tpu.core_type = #tpu.core_type<tc>, window_params = [{transform_indices = @transform_0, window_bounds = array<i64: 16, 32>}, {pipeline_mode = #tpu.pipeline_mode<synchronous>, transform_indices = @transform_1, window_bounds = array<i64: 32, 128>}, {pipeline_mode = #tpu.pipeline_mode<synchronous>, transform_indices = @transform_2, window_bounds = array<i64: 1, 128>}, {pipeline_mode = #tpu.pipeline_mode<synchronous>, transform_indices = @transform_3, window_bounds = array<i64: 128, 32>}, {pipeline_mode = #tpu.pipeline_mode<synchronous>, transform_indices = @transform_4, window_bounds = array<i64: 1, 32>}, {transform_indices = @transform_5, window_bounds = array<i64: 16, 32>}]} {
    %c0 = arith.constant 0 : index
    %c0_0 = arith.constant 0 : index
    %0 = vector.load %arg1[%c0, %c0_0] : memref<16x32xf32, #tpu.memory_space<vmem>>, vector<16x32xf32>
    %c0_1 = arith.constant 0 : index
    %c0_2 = arith.constant 0 : index
    %1 = vector.load %arg2[%c0_1, %c0_2] : memref<32x128xf32, #tpu.memory_space<vmem>>, vector<32x128xf32>
    %cst = arith.constant dense<0.000000e+00> : vector<16x128xf32>
    %2 = tpu.matmul %0, %1, %cst {dimension_numbers = #tpu.dot_dimension_numbers<[1], [0], [0], [1], [0, 0, 1, 1], [], []>} : vector<16x32xf32>, vector<32x128xf32>, vector<16x128xf32> -> vector<16x128xf32>
    %c0_3 = arith.constant 0 : index
    %c0_4 = arith.constant 0 : index
    %3 = vector.load %arg3[%c0_3, %c0_4] : memref<1x128xf32, #tpu.memory_space<vmem>>, vector<1x128xf32>
    %4 = vector.broadcast %3 : vector<1x128xf32> to vector<16x128xf32>
    %5 = arith.addf %2, %4 : vector<16x128xf32>
    %cst_5 = arith.constant 5.000000e-01 : f32
    %6 = vector.broadcast %cst_5 : f32 to vector<16x128xf32>
    %7 = arith.mulf %6, %5 : vector<16x128xf32>
    %cst_6 = arith.constant 0.707106769 : f32
    %8 = vector.broadcast %cst_6 : f32 to vector<16x128xf32>
    %9 = arith.mulf %5, %8 : vector<16x128xf32>
    %10 = math.erf %9 : vector<16x128xf32>
    %cst_7 = arith.constant 1.000000e+00 : f32
    %11 = vector.broadcast %cst_7 : f32 to vector<16x128xf32>
    %12 = arith.addf %11, %10 : vector<16x128xf32>
    %13 = arith.mulf %7, %12 : vector<16x128xf32>
    %c0_8 = arith.constant 0 : index
    %c0_9 = arith.constant 0 : index
    %14 = vector.load %arg4[%c0_8, %c0_9] : memref<128x32xf32, #tpu.memory_space<vmem>>, vector<128x32xf32>
    %cst_10 = arith.constant dense<0.000000e+00> : vector<16x32xf32>
    %15 = tpu.matmul %13, %14, %cst_10 {dimension_numbers = #tpu.dot_dimension_numbers<[1], [0], [0], [1], [0, 0, 1, 1], [], []>} : vector<16x128xf32>, vector<128x32xf32>, vector<16x32xf32> -> vector<16x32xf32>
    %c0_11 = arith.constant 0 : index
    %c0_12 = arith.constant 0 : index
    %16 = vector.load %arg5[%c0_11, %c0_12] : memref<1x32xf32, #tpu.memory_space<vmem>>, vector<1x32xf32>
    %17 = vector.broadcast %16 : vector<1x32xf32> to vector<16x32xf32>
    %18 = arith.addf %15, %17 : vector<16x32xf32>
    %c0_13 = arith.constant 0 : index
    %c0_14 = arith.constant 0 : index
    %19 = vector.load %arg6[%c0_13, %c0_14] : memref<16x32xf32, #tpu.memory_space<vmem>>, vector<16x32xf32>
    tpu.vector_store %arg6[%c0_13, %c0_14], %18 {strides = array<i32>} : memref<16x32xf32, #tpu.memory_space<vmem>>, vector<16x32xf32>,
    return
  }
  func.func @transform_0(%arg0: i32) -> (i32, i32) {
    %c0_i32 = arith.constant 0 : i32
    %c0_i32_0 = arith.constant 0 : i32
    return %arg0, %c0_i32 : i32, i32
  }
  func.func @transform_1(%arg0: i32) -> (i32, i32) {
    %c0_i32 = arith.constant 0 : i32
    %c0_i32_0 = arith.constant 0 : i32
    %c0_i32_1 = arith.constant 0 : i32
    return %c0_i32, %c0_i32_0 : i32, i32
  }
  func.func @transform_2(%arg0: i32) -> (i32, i32) {
    %c0_i32 = arith.constant 0 : i32
    %c0_i32_0 = arith.constant 0 : i32
    %c0_i32_1 = arith.constant 0 : i32
    return %c0_i32, %c0_i32_0 : i32, i32
  }
  func.func @transform_3(%arg0: i32) -> (i32, i32) {
    %c0_i32 = arith.constant 0 : i32
    %c0_i32_0 = arith.constant 0 : i32
    %c0_i32_1 = arith.constant 0 : i32
    return %c0_i32, %c0_i32_0 : i32, i32
  }
  func.func @transform_4(%arg0: i32) -> (i32, i32) {
    %c0_i32 = arith.constant 0 : i32
    %c0_i32_0 = arith.constant 0 : i32
    %c0_i32_1 = arith.constant 0 : i32
    return %c0_i32, %c0_i32_0 : i32, i32
  }
  func.func @transform_5(%arg0: i32) -> (i32, i32) {
    %c0_i32 = arith.constant 0 : i32
    %c0_i32_0 = arith.constant 0 : i32
    return %arg0, %c0_i32 : i32, i32
  }
}

</mosaic_0001>

<bundles_post_ra>
// kernel: feed_forward.1
= control target key start
LH: loop header
LB: loop body
LE: loop exit
PB: predicated region body
PF: predicated region fallthrough
CT: control target
= control target key end

     0   :  { %vm34_vm0 = vcmask 261120   ;;  %s508_s0 = inlined_call_operand.vmem [shape: f32[16,32], index: 0, kind: input, shape index: {}]   ;;  %s509_s1 = inlined_call_operand.vmem [shape: f32[32,128], index: 1, kind: input, shape index: {}]   ;;  %s510_s2 = inlined_call_operand.vmem [shape: f32[1,128], index: 2, kind: input, shape index: {}]   ;;  %s511_s3 = inlined_call_operand.vmem [shape: f32[128,32], index: 3, kind: input, shape index: {}]   ;;  %s512_s4 = inlined_call_operand.vmem [shape: f32[1,32], index: 4, kind: input, shape index: {}]   ;;  %s513_s5 = inlined_call_operand.hbm [shape: f32[16,32], index: 5, kind: output, shape index: {}]  }
   0x1   :  { %v23_v0 = vld [vmem:[%s509_s1] sm:$0xff]  ;;  %v24_v1 = vld [vmem:[%s509_s1 + $0x8] sm:$0xff]  ;;  %v25_v2 = vld [vmem:[%s509_s1 + $0x10] sm:$0xff] }
   0x2   :  { %v316_v3 = vpack.c.bf16 %v24_v1, %v23_v0  ;;  %v26_v4 = vld [vmem:[%s509_s1 + $0x18] sm:$0xff]  ;;  %v21_v5 = vld [vmem:[%s508_s0] sm:$0xff]  ;;  %v127_v8 = vld [vmem:[%s511_s3 + $0x8] sm:$0xff] }
   0x3   :  { %v320_v6 = vpack.c.bf16 %v26_v4, %v25_v2  ;;  %278 = vmatprep.mubr.msk.f32.mxu0 %vm34_vm0, %v21_v5  ;;  %v126_v7 = vld [vmem:[%s511_s3] sm:$0xff]  ;;  %v128_v9 = vld [vmem:[%s511_s3 + $0x10] sm:$0xff]  ;;  %v129_v11 = vld [vmem:[%s511_s3 + $0x18] sm:$0xff] }
   0x4   :  { %317 = vmatprep.subr.bf16.mxu0 %v316_v3  ;;  %v324_v10 = vpack.c.bf16 %v127_v8, %v126_v7  ;;  %v328_v12 = vpack.c.bf16 %v129_v11, %v128_v9  ;;  %v130_v13 = vld [vmem:[%s511_s3 + $0x20] sm:$0xff]  ;;  %v131_v14 = vld [vmem:[%s511_s3 + $0x28] sm:$0xff] }
   0x5   :  { %319 = vmatpush3.bf16.msra.mxu0 %v316_v3 }
   0x6   :  { %10 = vsyncpa [#allocation3], 0  ;;  %321 = vmatprep.subr.bf16.mxu0 %v320_v6  ;;  %325 = vmatprep.subr.bf16.mxu1 %v324_v10  ;;  %v332_v15 = vpack.c.bf16 %v131_v14, %v130_v13  ;;  %v22_v16 = vld [vmem:[%s508_s0 + $0x8] sm:$0xff]  ;;  %v132_v17 = vld [vmem:[%s511_s3 + $0x30] sm:$0xff]  ;;  %s387_s11 = smov [#allocation2]  }
   0x7   :  { %327 = vmatpush3.bf16.msra.mxu1 %v324_v10  ;;  %v133_v18 = vld [vmem:[%s511_s3 + $0x38] sm:$0xff]  ;;  %v134_v20 = vld [vmem:[%s511_s3 + $0x40] sm:$0xff]  ;;  %v135_v21 = vld [vmem:[%s511_s3 + $0x48] sm:$0xff]  ;;  %s231_s12 = sshll.u32 %s387_s11, 4  ;;  %s232_s12 = int_to_ptr.vmem [resolvable:$true] %s231_s12 }
   0x8   :  { %329 = vmatprep.subr.bf16.mxu1 %v328_v12  ;;  %v336_v19 = vpack.c.bf16 %v133_v18, %v132_v17  ;;  %v340_v22 = vpack.c.bf16 %v135_v21, %v134_v20  ;;  %v136_v23 = vld [vmem:[%s511_s3 + $0x50] sm:$0xff]  ;;  %v137_v24 = vld [vmem:[%s511_s3 + $0x58] sm:$0xff]  ;;  %v138_v26 = vld [vmem:[%s511_s3 + $0x60] sm:$0xff]  ;;  %s363_s13 = scalar_lea.vmem %s232_s12, 256  ;;  %p368_p1 = scmp.lt.s32.totalorder %s232_s12, %s232_s12 }
   0x9   :  { %323 = vmatpush3.bf16.msra.mxu0 %v320_v6  ;;  %v344_v25 = vpack.c.bf16 %v137_v24, %v136_v23  ;;  %v139_v27 = vld [vmem:[%s511_s3 + $0x68] sm:$0xff]  ;;  %v140_v29 = vld [vmem:[%s511_s3 + $0x70] sm:$0xff]  ;;  %v141_v30 = vld [vmem:[%s511_s3 + $0x78] sm:$0xff]  ;;  %p364_p0 = scmp.ne.s32.totalorder %s232_s12, %s363_s13  ;;  %p369_p2 = scmp.lt.s32.totalorder %s363_s13, %s363_s13 }
   0xa   :  { %v348_v28 = vpack.c.bf16 %v139_v27, %v138_v26  ;;  %v352_v31 = vpack.c.bf16 %v141_v30, %v140_v29  ;;  %v242_v32 = vld [vmem:[%s510_s2] ss:$0 sm:$0xff] }
   0xb   :  { %331 = vmatpush3.bf16.msra.mxu1 %v328_v12  ;;  %v245_v47 = vld [vmem:[%s512_s4] ss:$0 sm:$0xff]  ;;  %p370_p3 = por %p369_p2, %p368_p1 }
   0xc   :  { %279 = vmatmul.mubr.msk.f32.vlgmr.msra.gmra.mrb[0].mxu0 %vm34_vm0, %v22_v16  ;;  %333 = vmatprep.subr.bf16.mxu1 %v332_v15 }
   0xd   :  { %p371_p4 = pnand %p370_p3, %p364_p0 }
   0xf   :  { %335 = vmatpush3.bf16.msra.mxu1 %v332_v15 }
  0x10   :  { %337 = vmatprep.subr.bf16.mxu1 %v336_v19 }
  0x13   :  { %339 = vmatpush3.bf16.msra.mxu1 %v336_v19 }
  0x14   :  { %341 = vmatprep.subr.bf16.mxu1 %v340_v22 }
  0x17   :  { %343 = vmatpush3.bf16.msra.mxu1 %v340_v22 }
  0x18   :  { %345 = vmatprep.subr.bf16.mxu1 %v344_v25 }
  0x1b   :  { %347 = vmatpush3.bf16.msra.mxu1 %v344_v25 }
  0x1c   :  { %349 = vmatprep.subr.bf16.mxu1 %v348_v28 }
  0x1f   :  { %351 = vmatpush3.bf16.msra.mxu1 %v348_v28 }
  0x20   :  { %353 = vmatprep.subr.bf16.mxu1 %v352_v31 }
  0x23   :  { %355 = vmatpush3.bf16.msra.mxu1 %v352_v31 }
  0xdf   :  { %v280_v33 = vpop.f32.mrb[0].mxu0 }
  0xe0   :  { %v113_v34 = vadd.f32 %v280_v33, %v242_v32  ;;  %v107_v35 = vpop.f32.mrb[1].mxu0 }
  0xe1   :  { %v108_v36 = vadd.f32 %v242_v32, %v107_v35 }
  0xe2   :  { %v119_v37 = vmul.f32 0.70710677, %v113_v34  ;;  %v117_v44 = vmul.f32 0.5, %v113_v34 }
  0xe3   :  { %v118_v38 = vmul.f32 0.70710677, %v108_v36  ;;  %v116_v42 = vmul.f32 0.5, %v108_v36 }
  0xe4   :  { %359 = verf.f32 %v119_v37 }
  0xe5   :  { %361 = verf.f32 %v118_v38 }
  0xee   :  { %v360_v39 = vpop.eup %359 }
  0xef   :  { %v362_v40 = vpop.eup %361  ;;  %v123_v41 = vadd.f32 1.0, %v360_v39 }
  0xf0   :  { %v122_v43 = vadd.f32 1.0, %v362_v40 }
  0xf1   :  { %v125_v46 = vmul.f32 %v123_v41, %v117_v44 }
  0xf2   :  { %v124_v45 = vmul.f32 %v122_v43, %v116_v42 }
  0xf4   :  { %313 = vmatprep.mubr.f32.mxu1 %v124_v45 }
  0xf5   :  { %314 = vmatmul.mubr.f32.vlgmr.msra.gmra.mrb[0].mxu1 %v125_v46 }
 0x1c8   :  { %v315_v48 = vpop.f32.mrb[0].mxu1 }
 0x1c9   :  { %v221_v49 = vadd.f32 %v315_v48, %v245_v47  ;;  %v215_v50 = vpop.f32.mrb[1].mxu1 }
 0x1ca   :  { %v216_v51 = vadd.f32 %v245_v47, %v215_v50 }
 0x1cb   :  { %225 = vst.msk [vmem:[#allocation2 + $0x8] sm:$0xff] %vm34_vm0, %v221_v49 }
 0x1cc   :  { %224 = vst.msk [vmem:[#allocation2] sm:$0xff] %vm34_vm0, %v216_v51 }
 0x1cd   :  { %374 = shalt.err (!%p371_p4)
}
 0x1ce   :  { %s375_s15 = scalar_lea.hbm %s513_s5, 256 }
 0x1cf   :  { %p376_p5 = scmp.ne.s32.totalorder %s513_s5, %s375_s15  ;;  %p379_p6 = scmp.lt.u32.totalorder %s375_s15, %s513_s5 }
 0x1d1   :  { %p381_p7 = pnand %p379_p6, %p376_p5 }
 0x1d3   :  { %384 = shalt.err (!%p381_p7)
}
 0x1d4   :  { %s388_s20 = smov 128   ;;  %s389_s21 = smov 8  }
 0x1d5   :  { %237 = dma.vmem_to_hbm [thread:$0]  %s232_s12, 256, %s513_s5, [#allocation3], %s388_s20, %s388_s20, %s389_s21  }
 0x1d6   :  { %385 = dma.done.wait [#allocation3], 256  }
 0x1d7   :  { %386 = vsyncadd [#allocation3], 4294967040 }
 0x1d8   :  { %241 = vsyncpa [#allocation3], 1 }

</bundles_post_ra>
